<compile_context>
chip_gen: v5e
topology: v5e:2x2
jax: 0.10.0
libtpu: 0.0.40
codegen_flags: <defaults>
</compile_context>

<pallas_src>
import functools

import jax
import jax.numpy as jnp
import numpy as np
from jax.experimental import pallas as pl
from jax.experimental.pallas import tpu as pltpu

CIN = 144
COUT = 40
BN_EPS = 1e-5


# ---------------------------------------------------------------------------
# Tiling helper (static Python ints).
# ---------------------------------------------------------------------------
def _cdiv(a, b):
    return -(-a // b)


def _round_up(a, b):
    return _cdiv(a, b) * b


def _pick_tile(M, N, tm_target, min_steps):
    """Pick the spatial tile tm (multiple of 128, or M itself if M <= 128)."""
    if M <= 128:
        return M, 1
    tm = (min(tm_target, M) // 128) * 128
    num_mt = _cdiv(M, tm)
    if N * num_mt < min_steps:
        # Split the spatial axis so the grid has >= min_steps parallel steps
        # (keeps both TensorCores occupied on v7x for single-image shapes).
        want = min(min_steps, _cdiv(M, 128))
        tm = _round_up(_cdiv(M, want), 128)
        num_mt = _cdiv(M, tm)
    # Rebalance the tile size across the num_mt tiles.
    tm = min(tm, _round_up(_cdiv(M, num_mt), 128))
    num_mt = _cdiv(M, tm)
    return tm, num_mt


# ---------------------------------------------------------------------------
# Kernel 1: y = W_folded @ x_tile   (1x1 conv with the sigmoid gate folded in)
#           + per-tile partial sums / sums-of-squares for batch-norm stats.
# ---------------------------------------------------------------------------
def _gate_conv_stats_kernel(w_ref, x_ref, y_ref, sum_ref, ssq_ref,
                            *, last_valid, tm):
    x = x_ref[...]                                    # (Cin, tm)  f32
    w = w_ref[...]                                    # (Cout, Cin), gate folded
    y = jnp.dot(w, x, preferred_element_type=jnp.float32)     # (Cout, tm) f32

    # Store the conv output in bf16 (Pallas clips the OOB lanes of a partial
    # last tile); statistics are computed from the f32 values in-register.
    y_ref[...] = y.astype(y_ref.dtype)

    if last_valid == tm:
        # Every tile is full: no masking needed anywhere.
        sum_ref[...] = jnp.sum(y, axis=1, keepdims=True)        # (Cout, 1)
        ssq_ref[...] = jnp.sum(y * y, axis=1, keepdims=True)    # (Cout, 1)
    else:
        i = pl.program_id(1)
        last = pl.num_programs(1) - 1

        @pl.when(i < last)
        def _():
            sum_ref[...] = jnp.sum(y, axis=1, keepdims=True)
            ssq_ref[...] = jnp.sum(y * y, axis=1, keepdims=True)

        @pl.when(i == last)
        def _():
            # Only the last (partial) tile pays for lane masking, so the
            # statistics see only the real spatial elements.
            col = jax.lax.broadcasted_iota(jnp.int32, y.shape, 1)
            ym = jnp.where(col < last_valid, y, 0.0)
            sum_ref[...] = jnp.sum(ym, axis=1, keepdims=True)
            ssq_ref[...] = jnp.sum(ym * ym, axis=1, keepdims=True)


# ---------------------------------------------------------------------------
# Kernel 2: apply batch-norm (precomputed per-channel scale / shift).
# ---------------------------------------------------------------------------
def _bn_apply_kernel(y_ref, scale_ref, shift_ref, o_ref):
    # y_ref: (Cout, tm) bf16, scale/shift: (Cout, 1) f32, o_ref: (Cout, tm) f32
    y = y_ref[...].astype(jnp.float32)
    o_ref[...] = y * scale_ref[...] + shift_ref[...]


@functools.partial(jax.jit, static_argnames=("tm_target", "min_parallel_steps"))
def fused_forward(x47, x51, conv_w, bn_gamma, bn_beta, *,
                  tm_target=4096, min_parallel_steps=2):
    """x47: (N, Cin, H, W) NCHW, x51: (1, Cin, 1, 1). Returns (N, Cout, H, W)."""
    N, Cin, H, W = x47.shape
    M = H * W                                  # spatial length per batch image

    tm, num_mt = _pick_tile(M, N, tm_target, min_parallel_steps)
    last_valid = M - (num_mt - 1) * tm         # lanes valid in the last tile

    # Pure reshape (no NCHW -> NHWC transpose needed in this formulation).
    x_flat = x47.reshape(N, Cin, M).astype(jnp.float32)

    # Fold sigmoid(gate) into the 1x1-conv weight:  W'[o,c] = W[o,c]*sig(g[c]).
    gate = jax.nn.sigmoid(x51.reshape(1, Cin).astype(jnp.float32))   # (1, Cin)
    w_folded = conv_w.reshape(COUT, Cin).astype(jnp.float32) * gate  # (Cout, Cin)

    kernel1 = functools.partial(_gate_conv_stats_kernel,
                                last_valid=last_valid, tm=tm)

    y_flat, sum_p, ssq_p = pl.pallas_call(
        kernel1,
        out_shape=(
            jax.ShapeDtypeStruct((N, COUT, M), jnp.bfloat16),
            jax.ShapeDtypeStruct((N, num_mt, COUT, 1), jnp.float32),
            jax.ShapeDtypeStruct((N, num_mt, COUT, 1), jnp.float32),
        ),
        grid_spec=pltpu.PrefetchScalarGridSpec(
            num_scalar_prefetch=0,
            grid=(N, num_mt),
            in_specs=[
                pl.BlockSpec((COUT, CIN), lambda n, i: (0, 0)),           # weight
                pl.BlockSpec((None, CIN, tm), lambda n, i: (n, 0, i)),    # x tile
            ],
            out_specs=[
                pl.BlockSpec((None, COUT, tm), lambda n, i: (n, 0, i)),   # y tile
                pl.BlockSpec((None, None, COUT, 1), lambda n, i: (n, i, 0, 0)),
                pl.BlockSpec((None, None, COUT, 1), lambda n, i: (n, i, 0, 0)),
            ],
        ),
        compiler_params=pltpu.CompilerParams(
            dimension_semantics=("parallel", "parallel")),
    )(w_folded, x_flat)

    # Batch-norm statistics (training mode, biased variance over N*H*W),
    # reduced from the per-tile partials in XLA (tiny: N*num_mt*Cout elements).
    cnt = float(N * M)
    ch_sum = jnp.sum(sum_p[..., 0], axis=(0, 1))     # (Cout,)
    ch_ssq = jnp.sum(ssq_p[..., 0], axis=(0, 1))     # (Cout,)
    mean = ch_sum / cnt
    var = ch_ssq / cnt - mean * mean
    inv_std = jax.lax.rsqrt(var + BN_EPS)
    scale_v = bn_gamma.reshape(COUT).astype(jnp.float32) * inv_std
    shift_v = bn_beta.reshape(COUT).astype(jnp.float32) - mean * scale_v
    scale = scale_v.reshape(COUT, 1)
    shift = shift_v.reshape(COUT, 1)

    out_flat = pl.pallas_call(
        _bn_apply_kernel,
        out_shape=jax.ShapeDtypeStruct((N, COUT, M), jnp.float32),
        grid_spec=pltpu.PrefetchScalarGridSpec(
            num_scalar_prefetch=0,
            grid=(N, num_mt),
            in_specs=[
                pl.BlockSpec((None, COUT, tm), lambda n, i: (n, 0, i)),
                pl.BlockSpec((COUT, 1), lambda n, i: (0, 0)),
                pl.BlockSpec((COUT, 1), lambda n, i: (0, 0)),
            ],
            out_specs=pl.BlockSpec((None, COUT, tm), lambda n, i: (n, 0, i)),
        ),
        compiler_params=pltpu.CompilerParams(
            dimension_semantics=("parallel", "parallel")),
    )(y_flat, scale, shift)

    # (N, Cout, M) -> NCHW via pure reshape.
    return out_flat.reshape(N, COUT, H, W)


def _reference_forward(x47, x51, conv_w, bn_gamma, bn_beta):
    """Pure-JAX reference mirroring the PyTorch module (training-mode BN)."""
    g = jax.nn.sigmoid(x51)                                    # (1, Cin, 1, 1)
    xg = x47 * g                                               # (N, Cin, H, W)
    y = jnp.einsum("nchw,oc->nohw", xg, conv_w.reshape(COUT, CIN))
    mean = jnp.mean(y, axis=(0, 2, 3), keepdims=True)
    var = jnp.mean((y - mean) ** 2, axis=(0, 2, 3), keepdims=True)
    yhat = (y - mean) * jax.lax.rsqrt(var + BN_EPS)
    return yhat * bn_gamma.reshape(1, COUT, 1, 1) + bn_beta.reshape(1, COUT, 1, 1)


# TODO(synk): BatchNorm running_mean/running_var (track_running_stats) updates
# are not produced; only batch statistics are applied, matching the fused
# forward values.

if __name__ == "__main__":
    key = jax.random.PRNGKey(0)
    k1, k2, k3, k4, k5 = jax.random.split(key, 5)

    # Small spatial size; channel dims fixed by the module (144 -> 40).
    # H=W=14 gives M=196 (not a 128-multiple) -> exercises the partial-tile
    # masking path; N=2 exercises the batch grid axis.
    N, H, W = 2, 14, 14
    x47 = jax.random.normal(k1, (N, CIN, H, W), dtype=jnp.float32)
    x51 = jax.random.normal(k2, (1, CIN, 1, 1), dtype=jnp.float32)

    # Deterministic parameter init (synthetic; not a checkpoint load).
    conv_w = jax.random.normal(k3, (COUT, CIN, 1, 1), dtype=jnp.float32) * 0.05
    bn_gamma = 1.0 + 0.1 * jax.random.normal(k4, (COUT,), dtype=jnp.float32)
    bn_beta = 0.1 * jax.random.normal(k5, (COUT,), dtype=jnp.float32)

    out = fused_forward(x47, x51, conv_w, bn_gamma, bn_beta)
    out = jax.block_until_ready(out)

    ref = jax.block_until_ready(
        _reference_forward(x47, x51, conv_w, bn_gamma, bn_beta))
    # Tolerance loosened vs the f32-only version: the y intermediate is now
    # stored in bf16 (stats are still f32-exact).
    np.testing.assert_allclose(np.asarray(out), np.asarray(ref),
                               rtol=3e-2, atol=3e-2)

    print("KERNEL_OK")
</pallas_src>

<mosaic_0001>
module attributes {stable_mosaic.version = 11 : i64} {
  func.func @_gate_conv_stats_kernel(%arg0: i32, %arg1: i32, %arg2: memref<40x144xf32, #tpu.memory_space<vmem>>, %arg3: memref<1x144x128xf32, #tpu.memory_space<vmem>>, %arg4: memref<1x40x128xbf16, #tpu.memory_space<vmem>>, %arg5: memref<1x1x40x1xf32, #tpu.memory_space<vmem>>, %arg6: memref<1x1x40x1xf32, #tpu.memory_space<vmem>>) attributes {dimension_semantics = [#tpu.dimension_semantics<parallel>, #tpu.dimension_semantics<parallel>], iteration_bounds = array<i64: 2, 2>, scalar_prefetch = 0 : i64, scratch_operands = 0 : i64, tpu.core_type = #tpu.core_type<tc>, window_params = [{pipeline_mode = #tpu.pipeline_mode<synchronous>, transform_indices = @transform_0, window_bounds = array<i64: 40, 144>}, {transform_indices = @transform_1, window_bounds = array<i64: 1, 144, 128>}, {transform_indices = @transform_2, window_bounds = array<i64: 1, 40, 128>}, {transform_indices = @transform_3, window_bounds = array<i64: 1, 1, 40, 1>}, {transform_indices = @transform_4, window_bounds = array<i64: 1, 1, 40, 1>}]} {
    %c0 = arith.constant 0 : index
    %c0_0 = arith.constant 0 : index
    %c0_1 = arith.constant 0 : index
    %0 = vector.load %arg3[%c0, %c0_0, %c0_1] : memref<1x144x128xf32, #tpu.memory_space<vmem>>, vector<1x144x128xf32>
    %1 = vector.shape_cast %0 : vector<1x144x128xf32> to vector<144x128xf32>
    %c0_2 = arith.constant 0 : index
    %c0_3 = arith.constant 0 : index
    %2 = vector.load %arg2[%c0_2, %c0_3] : memref<40x144xf32, #tpu.memory_space<vmem>>, vector<40x144xf32>
    %cst = arith.constant dense<0.000000e+00> : vector<40x128xf32>
    %3 = tpu.matmul %2, %1, %cst {dimension_numbers = #tpu.dot_dimension_numbers<[1], [0], [0], [1], [0, 0, 1, 1], [], []>} : vector<40x144xf32>, vector<144x128xf32>, vector<40x128xf32> -> vector<40x128xf32>
    %4 = arith.truncf %3 : vector<40x128xf32> to vector<40x128xbf16>
    %c0_4 = arith.constant 0 : index
    %c0_5 = arith.constant 0 : index
    %c0_6 = arith.constant 0 : index
    %5 = vector.load %arg4[%c0_4, %c0_5, %c0_6] : memref<1x40x128xbf16, #tpu.memory_space<vmem>>, vector<1x40x128xbf16>
    %6 = vector.shape_cast %5 : vector<1x40x128xbf16> to vector<40x128xbf16>
    %7 = vector.shape_cast %4 : vector<40x128xbf16> to vector<1x40x128xbf16>
    tpu.vector_store %arg4[%c0_4, %c0_5, %c0_6], %7 {strides = array<i32>} : memref<1x40x128xbf16, #tpu.memory_space<vmem>>, vector<1x40x128xbf16>,
    %c1_i32 = arith.constant 1 : i32
    %8 = arith.cmpi slt, %arg1, %c1_i32 : i32
    %9 = arith.extui %8 : i1 to i32
    %c0_i32 = arith.constant 0 : i32
    %10 = arith.cmpi ne, %9, %c0_i32 : i32
    scf.if %10 {
      %cst_9 = arith.constant dense<0.000000e+00> : vector<40xf32>
      %14 = vector.multi_reduction <add>, %3, %cst_9 [1] : vector<40x128xf32> to vector<40xf32>
      %15 = vector.shape_cast %14 : vector<40xf32> to vector<40x1xf32>
      %c0_10 = arith.constant 0 : index
      %c0_11 = arith.constant 0 : index
      %c0_12 = arith.constant 0 : index
      %c0_13 = arith.constant 0 : index
      %16 = vector.load %arg5[%c0_10, %c0_11, %c0_12, %c0_13] : memref<1x1x40x1xf32, #tpu.memory_space<vmem>>, vector<1x1x40x1xf32>
      %17 = vector.shape_cast %16 : vector<1x1x40x1xf32> to vector<40x1xf32>
      %18 = vector.shape_cast %15 : vector<40x1xf32> to vector<1x1x40x1xf32>
      tpu.vector_store %arg5[%c0_10, %c0_11, %c0_12, %c0_13], %18 {strides = array<i32>} : memref<1x1x40x1xf32, #tpu.memory_space<vmem>>, vector<1x1x40x1xf32>,
      %19 = arith.mulf %3, %3 : vector<40x128xf32>
      %cst_14 = arith.constant dense<0.000000e+00> : vector<40xf32>
      %20 = vector.multi_reduction <add>, %19, %cst_14 [1] : vector<40x128xf32> to vector<40xf32>
      %21 = vector.shape_cast %20 : vector<40xf32> to vector<40x1xf32>
      %c0_15 = arith.constant 0 : index
      %c0_16 = arith.constant 0 : index
      %c0_17 = arith.constant 0 : index
      %c0_18 = arith.constant 0 : index
      %22 = vector.load %arg6[%c0_15, %c0_16, %c0_17, %c0_18] : memref<1x1x40x1xf32, #tpu.memory_space<vmem>>, vector<1x1x40x1xf32>
      %23 = vector.shape_cast %22 : vector<1x1x40x1xf32> to vector<40x1xf32>
      %24 = vector.shape_cast %21 : vector<40x1xf32> to vector<1x1x40x1xf32>
      tpu.vector_store %arg6[%c0_15, %c0_16, %c0_17, %c0_18], %24 {strides = array<i32>} : memref<1x1x40x1xf32, #tpu.memory_space<vmem>>, vector<1x1x40x1xf32>,
    } else {
    }
    %c1_i32_7 = arith.constant 1 : i32
    %11 = arith.cmpi eq, %arg1, %c1_i32_7 : i32
    %12 = arith.extui %11 : i1 to i32
    %c0_i32_8 = arith.constant 0 : i32
    %13 = arith.cmpi ne, %12, %c0_i32_8 : i32
    scf.if %13 {
      %14 = tpu.iota {dimensions = array<i32: 1>} : vector<40x128xi32>
      %c68_i32 = arith.constant 68 : i32
      %15 = vector.broadcast %c68_i32 : i32 to vector<40x128xi32>
      %16 = arith.cmpi slt, %14, %15 : vector<40x128xi32>
      %cst_9 = arith.constant 0.000000e+00 : f32
      %17 = vector.broadcast %cst_9 : f32 to vector<40x128xf32>
      %18 = arith.select %16, %3, %17 : vector<40x128xi1>, vector<40x128xf32>
      %cst_10 = arith.constant dense<0.000000e+00> : vector<40xf32>
      %19 = vector.multi_reduction <add>, %18, %cst_10 [1] : vector<40x128xf32> to vector<40xf32>
      %20 = vector.shape_cast %19 : vector<40xf32> to vector<40x1xf32>
      %c0_11 = arith.constant 0 : index
      %c0_12 = arith.constant 0 : index
      %c0_13 = arith.constant 0 : index
      %c0_14 = arith.constant 0 : index
      %21 = vector.load %arg5[%c0_11, %c0_12, %c0_13, %c0_14] : memref<1x1x40x1xf32, #tpu.memory_space<vmem>>, vector<1x1x40x1xf32>
      %22 = vector.shape_cast %21 : vector<1x1x40x1xf32> to vector<40x1xf32>
      %23 = vector.shape_cast %20 : vector<40x1xf32> to vector<1x1x40x1xf32>
      tpu.vector_store %arg5[%c0_11, %c0_12, %c0_13, %c0_14], %23 {strides = array<i32>} : memref<1x1x40x1xf32, #tpu.memory_space<vmem>>, vector<1x1x40x1xf32>,
      %24 = arith.mulf %18, %18 : vector<40x128xf32>
      %cst_15 = arith.constant dense<0.000000e+00> : vector<40xf32>
      %25 = vector.multi_reduction <add>, %24, %cst_15 [1] : vector<40x128xf32> to vector<40xf32>
      %26 = vector.shape_cast %25 : vector<40xf32> to vector<40x1xf32>
      %c0_16 = arith.constant 0 : index
      %c0_17 = arith.constant 0 : index
      %c0_18 = arith.constant 0 : index
      %c0_19 = arith.constant 0 : index
      %27 = vector.load %arg6[%c0_16, %c0_17, %c0_18, %c0_19] : memref<1x1x40x1xf32, #tpu.memory_space<vmem>>, vector<1x1x40x1xf32>
      %28 = vector.shape_cast %27 : vector<1x1x40x1xf32> to vector<40x1xf32>
      %29 = vector.shape_cast %26 : vector<40x1xf32> to vector<1x1x40x1xf32>
      tpu.vector_store %arg6[%c0_16, %c0_17, %c0_18, %c0_19], %29 {strides = array<i32>} : memref<1x1x40x1xf32, #tpu.memory_space<vmem>>, vector<1x1x40x1xf32>,
    } else {
    }
    return
  }
  func.func @transform_0(%arg0: i32, %arg1: i32) -> (i32, i32) {
    %c0_i32 = arith.constant 0 : i32
    %c0_i32_0 = arith.constant 0 : i32
    %c0_i32_1 = arith.constant 0 : i32
    return %c0_i32, %c0_i32_0 : i32, i32
  }
  func.func @transform_1(%arg0: i32, %arg1: i32) -> (i32, i32, i32) {
    %c0_i32 = arith.constant 0 : i32
    %c0_i32_0 = arith.constant 0 : i32
    return %arg0, %c0_i32, %arg1 : i32, i32, i32
  }
  func.func @transform_2(%arg0: i32, %arg1: i32) -> (i32, i32, i32) {
    %c0_i32 = arith.constant 0 : i32
    %c0_i32_0 = arith.constant 0 : i32
    return %arg0, %c0_i32, %arg1 : i32, i32, i32
  }
  func.func @transform_3(%arg0: i32, %arg1: i32) -> (i32, i32, i32, i32) {
    %c0_i32 = arith.constant 0 : i32
    %c0_i32_0 = arith.constant 0 : i32
    %c0_i32_1 = arith.constant 0 : i32
    return %arg0, %arg1, %c0_i32, %c0_i32_0 : i32, i32, i32, i32
  }
  func.func @transform_4(%arg0: i32, %arg1: i32) -> (i32, i32, i32, i32) {
    %c0_i32 = arith.constant 0 : i32
    %c0_i32_0 = arith.constant 0 : i32
    %c0_i32_1 = arith.constant 0 : i32
    return %arg0, %arg1, %c0_i32, %c0_i32_0 : i32, i32, i32, i32
  }
}

module attributes {stable_mosaic.version = 11 : i64} {
  func.func @_bn_apply_kernel(%arg0: i32, %arg1: i32, %arg2: memref<1x40x128xbf16, #tpu.memory_space<vmem>>, %arg3: memref<40x1xf32, #tpu.memory_space<vmem>>, %arg4: memref<40x1xf32, #tpu.memory_space<vmem>>, %arg5: memref<1x40x128xf32, #tpu.memory_space<vmem>>) attributes {dimension_semantics = [#tpu.dimension_semantics<parallel>, #tpu.dimension_semantics<parallel>], iteration_bounds = array<i64: 2, 2>, scalar_prefetch = 0 : i64, scratch_operands = 0 : i64, tpu.core_type = #tpu.core_type<tc>, window_params = [{transform_indices = @transform_0, window_bounds = array<i64: 1, 40, 128>}, {pipeline_mode = #tpu.pipeline_mode<synchronous>, transform_indices = @transform_1, window_bounds = array<i64: 40, 1>}, {pipeline_mode = #tpu.pipeline_mode<synchronous>, transform_indices = @transform_2, window_bounds = array<i64: 40, 1>}, {transform_indices = @transform_3, window_bounds = array<i64: 1, 40, 128>}]} {
    %c0 = arith.constant 0 : index
    %c0_0 = arith.constant 0 : index
    %c0_1 = arith.constant 0 : index
    %0 = vector.load %arg2[%c0, %c0_0, %c0_1] : memref<1x40x128xbf16, #tpu.memory_space<vmem>>, vector<1x40x128xbf16>
    %1 = vector.shape_cast %0 : vector<1x40x128xbf16> to vector<40x128xbf16>
    %2 = arith.extf %1 : vector<40x128xbf16> to vector<40x128xf32>
    %c0_2 = arith.constant 0 : index
    %c0_3 = arith.constant 0 : index
    %3 = vector.load %arg3[%c0_2, %c0_3] : memref<40x1xf32, #tpu.memory_space<vmem>>, vector<40x1xf32>
    %4 = vector.broadcast %3 : vector<40x1xf32> to vector<40x128xf32>
    %5 = arith.mulf %2, %4 : vector<40x128xf32>
    %c0_4 = arith.constant 0 : index
    %c0_5 = arith.constant 0 : index
    %6 = vector.load %arg4[%c0_4, %c0_5] : memref<40x1xf32, #tpu.memory_space<vmem>>, vector<40x1xf32>
    %7 = vector.broadcast %6 : vector<40x1xf32> to vector<40x128xf32>
    %8 = arith.addf %5, %7 : vector<40x128xf32>
    %c0_6 = arith.constant 0 : index
    %c0_7 = arith.constant 0 : index
    %c0_8 = arith.constant 0 : index
    %9 = vector.load %arg5[%c0_6, %c0_7, %c0_8] : memref<1x40x128xf32, #tpu.memory_space<vmem>>, vector<1x40x128xf32>
    %10 = vector.shape_cast %9 : vector<1x40x128xf32> to vector<40x128xf32>
    %11 = vector.shape_cast %8 : vector<40x128xf32> to vector<1x40x128xf32>
    tpu.vector_store %arg5[%c0_6, %c0_7, %c0_8], %11 {strides = array<i32>} : memref<1x40x128xf32, #tpu.memory_space<vmem>>, vector<1x40x128xf32>,
    return
  }
  func.func @transform_0(%arg0: i32, %arg1: i32) -> (i32, i32, i32) {
    %c0_i32 = arith.constant 0 : i32
    %c0_i32_0 = arith.constant 0 : i32
    return %arg0, %c0_i32, %arg1 : i32, i32, i32
  }
  func.func @transform_1(%arg0: i32, %arg1: i32) -> (i32, i32) {
    %c0_i32 = arith.constant 0 : i32
    %c0_i32_0 = arith.constant 0 : i32
    %c0_i32_1 = arith.constant 0 : i32
    return %c0_i32, %c0_i32_0 : i32, i32
  }
  func.func @transform_2(%arg0: i32, %arg1: i32) -> (i32, i32) {
    %c0_i32 = arith.constant 0 : i32
    %c0_i32_0 = arith.constant 0 : i32
    %c0_i32_1 = arith.constant 0 : i32
    return %c0_i32, %c0_i32_0 : i32, i32
  }
  func.func @transform_3(%arg0: i32, %arg1: i32) -> (i32, i32, i32) {
    %c0_i32 = arith.constant 0 : i32
    %c0_i32_0 = arith.constant 0 : i32
    return %arg0, %c0_i32, %arg1 : i32, i32, i32
  }
}

</mosaic_0001>

<bundles_post_ra>
// kernel: fused_forward.3
= control target key start
LH: loop header
LB: loop body
LE: loop exit
PB: predicated region body
PF: predicated region fallthrough
CT: control target
= control target key end

     0   :  { %s619_s12 = smov 0   ;;  %s621_s13 = smov 0   ;;  %s757_s0 = inlined_call_operand.vmem [shape: bf16[2,40,196], index: 0, kind: input, shape index: {}]   ;;  %s758_s1 = inlined_call_operand.vmem [shape: f32[40,1], index: 1, kind: input, shape index: {}]   ;;  %s759_s2 = inlined_call_operand.vmem [shape: f32[40,1], index: 2, kind: input, shape index: {}]   ;;  %s760_s3 = inlined_call_operand.vmem [shape: f32[2,40,196], index: 3, kind: output, shape index: {}]  }
   0x1   :  { %s623_s14 = smov 0   ;;  %s625_s15 = smov 0  }
   0x2   :  { %s627_s16 = smov 0   ;;  %s629_s17 = smov 0  }
   0x3   :  { %s631_s18 = smov 0  }
   0x4 LB: > { %s22_s19 = sadd.s32 1, %s588_s16  ;;  %s25_s20 = sadd.s32 1, %s592_s17  ;;  %s596_s18 = sphi %s631_s18, %s13_s18   ;;  %s592_s17 = sphi %s629_s17, %s767_s17   ;;  %s588_s16 = sphi %s627_s16, %s766_s16   ;;  %s584_s15 = sphi %s625_s15, %s765_s15   ;;  %s580_s14 = sphi %s623_s14, %s764_s14   ;;  %s576_s13 = sphi %s621_s13, %s763_s13   ;;  %s572_s12 = sphi %s619_s12, %s762_s12  }
   0x5   : > { %p23_p0 = scmp.ge.s32.totalorder %s22_s19, 2  ;;  %s459_s21 = sadd.s32 4294967295, %s596_s18  }
   0x6   : > { %p41_p1 = scmp.ne.s32.totalorder %s576_s13, %s572_s12  ;;  %p42_p2 = scmp.eq.s32.totalorder %s596_s18, 0 }
   0x7   : > { %s769_s19 = smov (%p23_p0, %s22_s19), 0  ;;  %s771_s20 = smov (!%p23_p0, %s25_s20), %s592_s17 }
   0x8   : > { %p27_p3 = scmp.ge.s32.totalorder %s771_s20, 2  ;;  %p115_p4 = scmp.eq.s32.totalorder %s459_s21, 3 }
   0x9   : > { %s30_s22 = ssub.s32 %s588_s16, %s769_s19  ;;  %p43_p5 = por %p42_p2, %p41_p1 }
   0xa   : > { %s773_s20 = smov (%p27_p3, %s771_s20), 0  ;;  %p667_p6 = por %p115_p4, %p41_p1 }
   0xb   : > { %s29_s24 = ssub.s32 %s592_s17, %s773_s20  ;;  %s34_s26 = sadd.s32 1, %s576_s13 }
   0xc   : > { %s31_s25 = sor.u32 %s30_s22, %s29_s24  ;;  %p462_p8 = scmp.ge.s32.totalorder %s596_s18, 4 }
   0xd   : > { %p32_p7 = scmp.eq.s32.totalorder %s31_s25, 0 }
   0xe   : > { %143 = sbr.rel (%p462_p8) target bundleno = 31 (0x1f), region = 24 }
   0xf   : > { %s675_s27 = scalar_select %p32_p7, %s576_s13, %s34_s26  }
  0x13   : > { %146 = sbr.rel (!%p43_p5) target bundleno = 31 (0x1f), region = 28  ;;  %s148_s28 = sand.u32 (%p43_p5), 1, %s576_s13  }
  0x14   : > { %s478_s29 = smul.u32 (%p43_p5), 10, %s592_s17 }
  0x15   : > { %s477_s30 = smul.u32 (%p43_p5), 20, %s148_s28 }
  0x16   : > { %s152_s4 = sadd.s32 (%p43_p5), %s588_s16, %s478_s29 }
  0x17   : > { %s463_s5 = sshll.u32 (%p43_p5), %s152_s4, 2  ;;  %s150_s9 = scalar_lea.vmem (%p43_p5), [#allocation2], %s477_s30 }
  0x18   : > { %s154_s8 = scalar_lea.vmem %s757_s0, %s463_s5 }
  0x19   : > { %v171_v0 = vld [vmem:[%s154_s8] sm:$0xf]  ;;  %v173_v1 = vld [vmem:[%s154_s8 + $0x8] sm:$0xf]  ;;  %v175_v2 = vld [vmem:[%s154_s8 + $0x10] sm:$0xf] }
  0x1a   : > { %172 = vst [vmem:[%s150_s9] sm:$0xf] %v171_v0  ;;  %v177_v3 = vld [vmem:[%s154_s8 + $0x18] sm:$0xf]  ;;  %v179_v4 = vld [vmem:[%s154_s8 + $0x20] sm:$0xf] }
  0x1b   : > { %174 = vst [vmem:[%s150_s9 + $0x4] sm:$0xf] %v173_v1 }
  0x1c   : > { %176 = vst [vmem:[%s150_s9 + $0x8] sm:$0xf] %v175_v2 }
  0x1d   : > { %178 = vst [vmem:[%s150_s9 + $0xc] sm:$0xf] %v177_v3 }
  0x1e   : > { %180 = vst [vmem:[%s150_s9 + $0x10] sm:$0xf] %v179_v4 }
  0x1f PF: > { %p464_p9 = scmp.ge.s32.totalorder %s596_s18, 1  ;;  %p213_p10 = scmp.lt.s32.totalorder %s596_s18, 5 }
  0x21   : > { %p214_p11 = pnand %p464_p9, %p213_p10 }
  0x22   : > { %s220_s24 = sand.u32 (!%p214_p11), 1, %s572_s12  }
  0x23   : > { %217 = sbr.rel (%p214_p11) target bundleno = 192 (0xc0), region = 69 }
  0x24   : > { %s479_s25 = smul.u32 (!%p214_p11), 20, %s220_s24 }
  0x25   : > { %s480_s28 = smul.u32 (!%p214_p11), 40, %s220_s24 }
  0x26   : > { %s222_s26 = scalar_lea.vmem (!%p214_p11), [#allocation2], %s479_s25 }
  0x27   : > { %s717_s29 = scalar_lea.vmem (!%p214_p11), [#allocation3], %s480_s28 }
  0x28   : > { %v254_v5 = vld [vmem:[%s758_s1 + $0x10] sm:$0xff]  ;;  %v252_v6 = vld [vmem:[%s758_s1] sm:$0xff]  ;;  %v598_v7 = vmov 0   ;;  %v255_v9 = vld [vmem:[%s758_s1 + $0x18] sm:$0xff]  ;;  %s481_s12 = smul.u32 (%p667_p6), 10, %s584_s15 }
  0x29   : > { %540 = vset.pattern.permute.xlu1 %v598_v7  ;;  %539 = vset.pattern.permute.xlu0 %v598_v7  ;;  %v256_v8 = vld [vmem:[%s758_s1 + $0x20] sm:$0xff]  ;;  %v253_v10 = vld [vmem:[%s758_s1 + $0x8] sm:$0xff]  ;;  %v289_v12 = vld [vmem:[%s759_s2 + $0x10] sm:$0xff] }
  0x2a   : > { %269 = vperm.xlu1 %540, %v254_v5   ;;  %259 = vperm.xlu0 %539, %v252_v6   ;;  %v287_v11 = vld [vmem:[%s759_s2] sm:$0xff]  ;;  %v288_v13 = vld [vmem:[%s759_s2 + $0x8] sm:$0xff]  ;;  %v290_v14 = vld [vmem:[%s759_s2 + $0x18] sm:$0xff]  ;;  %s335_s30 = sadd.s32 (%p667_p6), %s580_s14, %s481_s12 }
  0x2b   : > { %541 = vset.pattern.permute.xlu2 %v598_v7  ;;  %v291_v15 = vld [vmem:[%s759_s2 + $0x20] sm:$0xff]  ;;  %s465_s4 = sshll.u32 (%p667_p6), %s335_s30, 3 }
  0x2c   : > { %279 = vperm.xlu2 %541, %v256_v8   ;;  %v469_v17 = vld [vmem:[%s222_s26] sm:$0xff]   ;;  %v476_v23 = vld [vmem:[%s222_s26 + $0x8] sm:$0xff]   ;;  %v246_v35 = vld [vmem:[%s222_s26 + $0x10] sm:$0xf]  ;;  %s337_s7 = scalar_lea.vmem (%p667_p6), %s760_s3, %s465_s4 }
  0x2d   : > { %v470_v18 = vunpack.c.l.bf16 %v469_v17  ;;  %v475_v25 = vunpack.c.h.bf16 %v476_v23  ;;  %v474_v30 = vunpack.c.l.bf16 %v476_v23  ;;  %v471_v32 = vunpack.c.h.bf16 %v469_v17 }
  0x2e   : > { %v251_v40 = vunpack.c.l.bf16 %v246_v35 }
  0x32   : > { %274 = vperm.xlu1 %540, %v255_v9   ;;  %264 = vperm.xlu0 %539, %v253_v10  }
  0x34   : > { %294 = vperm.xlu2 %541, %v287_v11  }
  0x3a   : > { %304 = vperm.xlu1 %540, %v289_v12   ;;  %299 = vperm.xlu0 %539, %v288_v13  }
  0x3c   : > { %309 = vperm.xlu2 %541, %v290_v14  }
  0x42   : > { %314 = vperm.xlu0 %539, %v291_v15  }
  0x86   : > { %v280_v16 = vpop.permute.xlu2 %279 }
  0x87   : > { %v286_v41 = vmul.f32 %v280_v16, %v251_v40 }
  0x8e   : > { %v295_v19 = vpop.permute.xlu2 %294 }
  0x96   : > { %v310_v29 = vpop.permute.xlu2 %309 }
  0x9c   : > { %v270_v20 = vpop.permute.xlu1 %269  ;;  %v260_v21 = vpop.permute.xlu0 %259 }
  0x9d   : > { %v282_v22 = vmul.f32 %v470_v18, %v260_v21  ;;  %v284_v33 = vmul.f32 %v474_v30, %v270_v20 }
  0x9f   : > { %v317_v24 = vadd.f32 %v295_v19, %v282_v22 }
  0xa1   : > { %322 = vst [vmem:[%s717_s29] sm:$0xff] %v317_v24 }
  0xa4   : > { %v275_v26 = vpop.permute.xlu1 %274  ;;  %v265_v27 = vpop.permute.xlu0 %264 }
  0xa5   : > { %v285_v28 = vmul.f32 %v475_v25, %v275_v26  ;;  %v283_v34 = vmul.f32 %v471_v32, %v265_v27 }
  0xa7   : > { %v320_v31 = vadd.f32 %v310_v29, %v285_v28 }
  0xa8   : > { %v374_v44 = vld [vmem:[%s717_s29] sm:$0xff] (%p667_p6) }
  0xa9   : > { %325 = vst [vmem:[%s717_s29 + $0x18] sm:$0xff] %v320_v31 }
  0xaa   : > { %375 = vst [vmem:[%s337_s7] sm:$0xff] (%p667_p6), %v374_v44 }
  0xac   : > { %v305_v36 = vpop.permute.xlu1 %304  ;;  %v300_v37 = vpop.permute.xlu0 %299 }
  0xad   : > { %v319_v38 = vadd.f32 %v305_v36, %v284_v33  ;;  %v318_v39 = vadd.f32 %v300_v37, %v283_v34 }
  0xaf   : > { %324 = vst [vmem:[%s717_s29 + $0x10] sm:$0xff] %v319_v38 }
  0xb0   : > { %323 = vst [vmem:[%s717_s29 + $0x8] sm:$0xff] %v318_v39  ;;  %v380_v47 = vld [vmem:[%s717_s29 + $0x18] sm:$0xff] (%p667_p6) }
  0xb1   : > { %381 = vst [vmem:[%s337_s7 + $0x30] sm:$0xff] (%p667_p6), %v380_v47 }
  0xb3   : > { %333 = sbr.rel (!%p667_p6) target bundleno = 192 (0xc0), region = 77 }
  0xb4   : > { %v315_v42 = vpop.permute.xlu0 %314 }
  0xb5   : > { %v321_v43 = vadd.f32 %v315_v42, %v286_v41 }
  0xb6   : > { %v378_v46 = vld [vmem:[%s717_s29 + $0x10] sm:$0xff] (%p667_p6) }
  0xb7   : > { %326 = vst [vmem:[%s717_s29 + $0x20] sm:$0xff] %v321_v43  ;;  %v376_v45 = vld [vmem:[%s717_s29 + $0x8] sm:$0xff] (%p667_p6) }
  0xb8   : > { %377 = vst [vmem:[%s337_s7 + $0x10] sm:$0xff] %v376_v45 }
  0xb9   : > { %379 = vst [vmem:[%s337_s7 + $0x20] sm:$0xff] %v378_v46 }
  0xbe   : > { %v382_v48 = vld [vmem:[%s717_s29 + $0x20] sm:$0xff] }
  0xbf   : > { %383 = vst [vmem:[%s337_s7 + $0x40] sm:$0xff] %v382_v48 }
  0xc0 PF: > { %s13_s18 = sadd.s32 1, %s596_s18   ;;  %s762_s12 = smov %s576_s13 }
  0xc1   : > { %p10_p12 = scmp.ge.s32.totalorder %s13_s18, 6   ;;  %s763_s13 = smov %s675_s27 }
  0xc2   : > { %s764_s14 = smov %s588_s16  ;;  %s765_s15 = smov %s592_s17 }
  0xc3   : > { %s766_s16 = smov %s769_s19  ;;  %s767_s17 = smov %s773_s20 }
  0xc4   :  { %12 = sbr.rel (!%p10_p12) target bundleno = 4 (0x4), region = 146 }

// kernel: fused_forward.2
= control target key start
LH: loop header
LB: loop body
LE: loop exit
PB: predicated region body
PF: predicated region fallthrough
CT: control target
= control target key end

     0   :  { %s1015_s15 = smov 0   ;;  %s1017_s16 = smov 0   ;;  %s1283_s0 = inlined_call_operand.vmem [shape: f32[40,144], index: 0, kind: input, shape index: {}]   ;;  %s1284_s1 = inlined_call_operand.vmem [shape: f32[2,144,196], index: 1, kind: input, shape index: {}]   ;;  %s1285_s2 = inlined_call_operand.vmem [shape: bf16[2,40,196], index: 2, kind: output, shape index: {0}]   ;;  %s1286_s3 = inlined_call_operand.vmem [shape: f32[2,2,40,1], index: 3, kind: output, shape index: {1}]   ;;  %s1287_s4 = inlined_call_operand.vmem [shape: f32[2,2,40,1], index: 4, kind: output, shape index: {2}]  }
   0x1   :  { %s1019_s17 = smov 0   ;;  %s1021_s18 = smov 0  }
   0x2   :  { %s1023_s19 = smov 0   ;;  %s1025_s20 = smov 0  }
   0x3   :  { %s1027_s21 = smov 0  }
   0x4 LB: > { %s24_s22 = sadd.s32 1, %s980_s19  ;;  %s27_s23 = sadd.s32 1, %s984_s20  ;;  %s988_s21 = sphi %s1027_s21, %s15_s21   ;;  %s984_s20 = sphi %s1025_s20, %s1294_s20   ;;  %s980_s19 = sphi %s1023_s19, %s1293_s19   ;;  %s976_s18 = sphi %s1021_s18, %s1292_s18   ;;  %s972_s17 = sphi %s1019_s17, %s1291_s17   ;;  %s968_s16 = sphi %s1017_s16, %s1290_s16   ;;  %s964_s15 = sphi %s1015_s15, %s1289_s15  }
   0x5   : > { %p25_p0 = scmp.ge.s32.totalorder %s24_s22, 2  ;;  %s810_s24 = sadd.s32 4294967295, %s988_s21  }
   0x6   : > { %p64_p1 = scmp.ne.s32.totalorder %s968_s16, %s964_s15  ;;  %p65_p2 = scmp.eq.s32.totalorder %s988_s21, 0 }
   0x7   : > { %s1296_s22 = smov (%p25_p0, %s24_s22), 0  ;;  %s1298_s23 = smov (!%p25_p0, %s27_s23), %s984_s20 }
   0x8   : > { %p29_p3 = scmp.ge.s32.totalorder %s1298_s23, 2  ;;  %p96_p4 = scmp.eq.s32.totalorder %s810_s24, 3 }
   0x9   : > { %s53_s25 = ssub.s32 %s980_s19, %s1296_s22  ;;  %p66_p5 = por %p65_p2, %p64_p1 }
   0xa   : > { %s1300_s23 = smov (%p29_p3, %s1298_s23), 0  ;;  %p1063_p6 = por %p96_p4, %p64_p1 }
   0xb   : > { %s52_s27 = ssub.s32 %s984_s20, %s1300_s23  ;;  %s57_s29 = sadd.s32 1, %s968_s16 }
   0xc   : > { %s54_s28 = sor.u32 %s53_s25, %s52_s27  ;;  %p813_p8 = scmp.ge.s32.totalorder %s988_s21, 4 }
   0xd   : > { %p55_p7 = scmp.eq.s32.totalorder %s54_s28, 0 }
   0xe   : > { %177 = sbr.rel (%p813_p8) target bundleno = 44 (0x2c), region = 20 }
   0xf   : > { %s1071_s30 = scalar_select %p55_p7, %s968_s16, %s57_s29  }
  0x13   : > { %180 = sbr.rel (!%p66_p5) target bundleno = 44 (0x2c), region = 24  ;;  %s182_s5 = sand.u32 (%p66_p5), 1, %s968_s16  }
  0x14   : > { %s872_s6 = smul.u32 (%p66_p5), 36, %s984_s20 }
  0x15   : > { %s871_s7 = smul.u32 (%p66_p5), 144, %s182_s5 }
  0x16   : > { %s186_s8 = sadd.s32 (%p66_p5), %s980_s19, %s872_s6 }
  0x17   : > { %s814_s9 = sshll.u32 (%p66_p5), %s186_s8, 3  ;;  %s1085_s13 = scalar_lea.vmem (%p66_p5), [#allocation2], %s871_s7 }
  0x18   : > { %s1080_s12 = scalar_lea.vmem %s1284_s1, %s814_s9 }
  0x19   : > { %v251_v0 = vld [vmem:[%s1080_s12] sm:$0xff]  ;;  %v253_v1 = vld [vmem:[%s1080_s12 + $0x10] sm:$0xff] }
  0x1a   : > { %v255_v2 = vld [vmem:[%s1080_s12 + $0x20] sm:$0xff]  ;;  %252 = vst [vmem:[%s1085_s13] sm:$0xff] %v251_v0  ;;  %v257_v3 = vld [vmem:[%s1080_s12 + $0x30] sm:$0xff] }
  0x1b   : > { %254 = vst [vmem:[%s1085_s13 + $0x8] sm:$0xff] %v253_v1  ;;  %v259_v4 = vld [vmem:[%s1080_s12 + $0x40] sm:$0xff]  ;;  %v261_v5 = vld [vmem:[%s1080_s12 + $0x50] sm:$0xff] }
  0x1c   : > { %256 = vst [vmem:[%s1085_s13 + $0x10] sm:$0xff] %v255_v2  ;;  %v263_v6 = vld [vmem:[%s1080_s12 + $0x60] sm:$0xff]  ;;  %v265_v7 = vld [vmem:[%s1080_s12 + $0x70] sm:$0xff] }
  0x1d   : > { %258 = vst [vmem:[%s1085_s13 + $0x18] sm:$0xff] %v257_v3  ;;  %v267_v8 = vld [vmem:[%s1080_s12 + $0x80] sm:$0xff]  ;;  %v269_v9 = vld [vmem:[%s1080_s12 + $0x90] sm:$0xff] }
  0x1e   : > { %260 = vst [vmem:[%s1085_s13 + $0x20] sm:$0xff] %v259_v4  ;;  %v271_v10 = vld [vmem:[%s1080_s12 + $0xa0] sm:$0xff]  ;;  %v273_v11 = vld [vmem:[%s1080_s12 + $0xb0] sm:$0xff] }
  0x1f   : > { %262 = vst [vmem:[%s1085_s13 + $0x28] sm:$0xff] %v261_v5  ;;  %v275_v12 = vld [vmem:[%s1080_s12 + $0xc0] sm:$0xff]  ;;  %v277_v13 = vld [vmem:[%s1080_s12 + $0xd0] sm:$0xff] }
  0x20   : > { %264 = vst [vmem:[%s1085_s13 + $0x30] sm:$0xff] %v263_v6  ;;  %v279_v14 = vld [vmem:[%s1080_s12 + $0xe0] sm:$0xff]  ;;  %v281_v15 = vld [vmem:[%s1080_s12 + $0xf0] sm:$0xff] }
  0x21   : > { %266 = vst [vmem:[%s1085_s13 + $0x38] sm:$0xff] %v265_v7  ;;  %v283_v16 = vld [vmem:[%s1080_s12 + $0x100] sm:$0xff]  ;;  %v285_v17 = vld [vmem:[%s1080_s12 + $0x110] sm:$0xff] }
  0x22   : > { %268 = vst [vmem:[%s1085_s13 + $0x40] sm:$0xff] %v267_v8 }
  0x23   : > { %270 = vst [vmem:[%s1085_s13 + $0x48] sm:$0xff] %v269_v9 }
  0x24   : > { %272 = vst [vmem:[%s1085_s13 + $0x50] sm:$0xff] %v271_v10 }
  0x25   : > { %274 = vst [vmem:[%s1085_s13 + $0x58] sm:$0xff] %v273_v11 }
  0x26   : > { %276 = vst [vmem:[%s1085_s13 + $0x60] sm:$0xff] %v275_v12 }
  0x27   : > { %278 = vst [vmem:[%s1085_s13 + $0x68] sm:$0xff] %v277_v13 }
  0x28   : > { %280 = vst [vmem:[%s1085_s13 + $0x70] sm:$0xff] %v279_v14 }
  0x29   : > { %282 = vst [vmem:[%s1085_s13 + $0x78] sm:$0xff] %v281_v15 }
  0x2a   : > { %284 = vst [vmem:[%s1085_s13 + $0x80] sm:$0xff] %v283_v16 }
  0x2b   : > { %286 = vst [vmem:[%s1085_s13 + $0x88] sm:$0xff] %v285_v17 }
  0x2c PF: > { %p815_p9 = scmp.ge.s32.totalorder %s988_s21, 1  ;;  %p291_p10 = scmp.lt.s32.totalorder %s988_s21, 5 }
  0x2e   : > { %p292_p11 = pnand %p815_p9, %p291_p10 }
  0x2f   : > { %s298_s14 = sand.u32 (!%p292_p11), 1, %s964_s15   ;;  %p340_p12 = scmp.lt.s32.totalorder (!%p292_p11), %s976_s18, 1 }
  0x30   : > { %295 = sbr.rel (%p292_p11) target bundleno = 538 (0x21a), region = 62  ;;  %p342_p13 = scmp.lt.s32.totalorder (!%p292_p11), %s972_s17, 1 }
  0x31   : > { %s873_s24 = smul.u32 (!%p292_p11), 144, %s298_s14  ;;  %p823_p0 = scmp.ge.s32.totalorder (!%p292_p11), %s972_s17, 1 }
  0x32   : > { %s874_s9 = smul.u32 (!%p292_p11), 20, %s298_s14 }
  0x33   : > { %s1129_s28 = scalar_lea.vmem (!%p292_p11), [#allocation2], %s873_s24 }
  0x34   : > { %s1199_s10 = scalar_lea.vmem (!%p292_p11), [#allocation3], %s874_s9 }
  0x35   : > { %s341_s25 = scalar_select %p340_p12, %s976_s18, 1  ;;  %v373_v18 = vld [vmem:[%s1129_s28 + $0x78] sm:$0xff]  ;;  %v372_v19 = vld [vmem:[%s1129_s28 + $0x70] sm:$0xff]  ;;  %v371_v20 = vld [vmem:[%s1129_s28 + $0x68] sm:$0xff]  ;;  %vm386_vm0 = vcmask 130048  }
  0x36   : > { %s343_s27 = scalar_select %p342_p13, %s972_s17, 1  ;;  %402 = vmatpush.msra.mxu0 %v373_v18  ;;  %839 = vmatpush.msra.mxu2 %v373_v18  ;;  %v375_v21 = vld [vmem:[%s1129_s28 + $0x88] sm:$0xff]  ;;  %v374_v22 = vld [vmem:[%s1129_s28 + $0x80] sm:$0xff]  ;;  %v369_v25 = vld [vmem:[%s1129_s28 + $0x58] sm:$0xff] }
  0x37   : > { %s876_s29 = smul.u32 10, %s341_s25  ;;  %840 = vmatpush.msra.mxu3 %v373_v18  ;;  %v370_v23 = vld [vmem:[%s1129_s28 + $0x60] sm:$0xff]  ;;  %448 = vmatpush.msra.mxu1 %v375_v21  ;;  %v377_v24 = vld [vmem:[%s1283_s0 + $0x8] sm:$0xff]  ;;  %v368_v26 = vld [vmem:[%s1129_s28 + $0x50] sm:$0xff] }
  0x38   : > { %s875_s5 = smul.u32 5, %s343_s27  ;;  %403 = vmatpush.msra.mxu0 %v372_v19  ;;  %841 = vmatpush.msra.mxu2 %v372_v19  ;;  %v367_v27 = vld [vmem:[%s1129_s28 + $0x48] sm:$0xff]  ;;  %v366_v28 = vld [vmem:[%s1129_s28 + $0x40] sm:$0xff]  ;;  %v365_v30 = vld [vmem:[%s1129_s28 + $0x38] sm:$0xff] }
  0x39   : > { %842 = vmatpush.msra.mxu3 %v372_v19  ;;  %449 = vmatpush.msra.mxu1 %v374_v22  ;;  %v379_v29 = vld [vmem:[%s1283_s0 + $0x18] sm:$0xff]  ;;  %v364_v31 = vld [vmem:[%s1129_s28 + $0x30] sm:$0xff]  ;;  %v362_v33 = vld [vmem:[%s1129_s28 + $0x20] sm:$0xff] }
  0x3a   : > { %s346_s6 = sadd.s32 %s876_s29, %s875_s5  ;;  %404 = vmatpush.msra.mxu0 %v371_v20  ;;  %843 = vmatpush.msra.mxu2 %v371_v20  ;;  %v363_v32 = vld [vmem:[%s1129_s28 + $0x28] sm:$0xff]  ;;  %v361_v35 = vld [vmem:[%s1129_s28 + $0x18] sm:$0xff]  ;;  %v360_v36 = vld [vmem:[%s1129_s28 + $0x10] sm:$0xff] }
  0x3b   : > { %s816_s7 = sshll.u32 %s346_s6, 3  ;;  %844 = vmatpush.msra.mxu3 %v371_v20  ;;  %818 = vmatmul.msk.f32.vlgmr.msra.gmra.mxu1 %vm386_vm0, %v377_v24  ;;  %v381_v34 = vld [vmem:[%s1283_s0 + $0x28] sm:$0xff]  ;;  %v358_v38 = vld [vmem:[%s1129_s28] sm:$0xff]  ;;  %v383_v42 = vld [vmem:[%s1283_s0 + $0x38] sm:$0xff] }
  0x3c   : > { %s1143_s12 = scalar_lea.vmem %s1286_s3, %s816_s7  ;;  %s1148_s25 = scalar_lea.vmem %s1287_s4, %s816_s7  ;;  %405 = vmatpush.msra.mxu0 %v370_v23  ;;  %845 = vmatpush.msra.mxu2 %v370_v23  ;;  %v359_v37 = vld [vmem:[%s1129_s28 + $0x8] sm:$0xff]  ;;  %v376_v39 = vld [vmem:[%s1283_s0] sm:$0xff]  ;;  %v378_v40 = vld [vmem:[%s1283_s0 + $0x10] sm:$0xff] }
  0x3d   : > { %846 = vmatpush.msra.mxu3 %v370_v23  ;;  %v382_v41 = vld [vmem:[%s1283_s0 + $0x30] sm:$0xff]  ;;  %v380_v43 = vld [vmem:[%s1283_s0 + $0x20] sm:$0xff]  ;;  %v385_v45 = vld [vmem:[%s1283_s0 + $0x48] sm:$0xff] }
  0x3e   : > { %406 = vmatpush.msra.mxu0 %v369_v25  ;;  %847 = vmatpush.msra.mxu2 %v369_v25  ;;  %v384_v44 = vld [vmem:[%s1283_s0 + $0x40] sm:$0xff] }
  0x3f   : > { %848 = vmatpush.msra.mxu3 %v369_v25 }
  0x40   : > { %407 = vmatpush.msra.mxu0 %v368_v26  ;;  %849 = vmatpush.msra.mxu2 %v368_v26 }
  0x41   : > { %850 = vmatpush.msra.mxu3 %v368_v26 }
  0x42   : > { %408 = vmatpush.msra.mxu0 %v367_v27  ;;  %851 = vmatpush.msra.mxu2 %v367_v27 }
  0x43   : > { %852 = vmatpush.msra.mxu3 %v367_v27  ;;  %819 = vmatmul.msk.f32.gmra.mxu1 %vm386_vm0, %v379_v29 }
  0x44   : > { %409 = vmatpush.msra.mxu0 %v366_v28  ;;  %853 = vmatpush.msra.mxu2 %v366_v28 }
  0x45   : > { %854 = vmatpush.msra.mxu3 %v366_v28 }
  0x46   : > { %410 = vmatpush.msra.mxu0 %v365_v30  ;;  %855 = vmatpush.msra.mxu2 %v365_v30 }
  0x47   : > { %856 = vmatpush.msra.mxu3 %v365_v30 }
  0x48   : > { %411 = vmatpush.msra.mxu0 %v364_v31  ;;  %857 = vmatpush.msra.mxu2 %v364_v31 }
  0x49   : > { %858 = vmatpush.msra.mxu3 %v364_v31 }
  0x4a   : > { %412 = vmatpush.msra.mxu0 %v363_v32  ;;  %859 = vmatpush.msra.mxu2 %v363_v32 }
  0x4b   : > { %860 = vmatpush.msra.mxu3 %v363_v32  ;;  %820 = vmatmul.msk.f32.gmra.mxu1 %vm386_vm0, %v381_v34 }
  0x4c   : > { %413 = vmatpush.msra.mxu0 %v362_v33  ;;  %861 = vmatpush.msra.mxu2 %v362_v33 }
  0x4d   : > { %862 = vmatpush.msra.mxu3 %v362_v33 }
  0x4e   : > { %414 = vmatpush.msra.mxu0 %v361_v35  ;;  %863 = vmatpush.msra.mxu2 %v361_v35 }
  0x4f   : > { %864 = vmatpush.msra.mxu3 %v361_v35 }
  0x50   : > { %415 = vmatpush.msra.mxu0 %v360_v36  ;;  %865 = vmatpush.msra.mxu2 %v360_v36 }
  0x51   : > { %866 = vmatpush.msra.mxu3 %v360_v36 }
  0x52   : > { %416 = vmatpush.msra.mxu0 %v359_v37  ;;  %867 = vmatpush.msra.mxu2 %v359_v37 }
  0x53   : > { %868 = vmatpush.msra.mxu3 %v359_v37  ;;  %821 = vmatmul.msk.f32.gmra.mxu1 %vm386_vm0, %v383_v42 }
  0x54   : > { %417 = vmatpush.msra.mxu0 %v358_v38  ;;  %869 = vmatpush.msra.mxu2 %v358_v38 }
  0x55   : > { %870 = vmatpush.msra.mxu3 %v358_v38  ;;  %418 = vmatmul.f32.vlgmr.msra.gmra.mxu0 %v376_v39 }
  0x56   : > { %421 = vmatmul.f32.vlgmr.msra.gmra.mxu2 %v378_v40  ;;  %427 = vmatmul.f32.vlgmr.msra.gmra.mxu3 %v382_v41 }
  0x5b   : > { %822 = vmatmul.msk.f32.gmra.mxu1 %vm386_vm0, %v385_v45 }
  0x5e   : > { %424 = vmatmul.f32.gmra.mxu2 %v380_v43  ;;  %430 = vmatmul.f32.gmra.mxu3 %v384_v44 }
  0xb8   : > { %v451_v46 = vpop.f32.mrf.mxu1 }
  0xc0   : > { %v454_v47 = vpop.f32.mrf.mxu1 }
  0xc8   : > { %v457_v48 = vpop.f32.mrf.mxu1 }
  0xd0   : > { %v460_v49 = vpop.f32.mrf.mxu1 }
  0xd2   : > { %v419_v50 = vpop.f32.mrf.mxu0 }
  0xd3   : > { %v452_v53 = vadd.f32 %v451_v46, %v419_v50 }
  0xd8   : > { %v463_v56 = vpop.f32.mrf.mxu1 }
  0xd9   : > { %v422_v51 = vpop.f32.mrf.mxu2  ;;  %v428_v52 = vpop.f32.mrf.mxu3 }
  0xda   : > { %v1196_v54 = vadd.f32 %v454_v47, %v422_v51  ;;  %v461_v59 = vadd.f32 %v460_v49, %v428_v52 }
  0xdc   : > { %v831_v55 = vpack.c.bf16 %v1196_v54, %v452_v53 }
  0xde   : > { %832 = vst [vmem:[%s1199_s10] sm:$0xff] %v831_v55  }
  0xe1   : > { %v425_v57 = vpop.f32.mrf.mxu2  ;;  %v431_v58 = vpop.f32.mrf.mxu3 }
  0xe2   : > { %v458_v60 = vadd.f32 %v457_v48, %v425_v57  ;;  %v464_v61 = vadd.f32 %v463_v56, %v431_v58 }
  0xe3   : > { %479 = sbr.rel (%p823_p0) target bundleno = 373 (0x175), region = 70 }
  0xe4   : > { %v836_v62 = vpack.c.bf16 %v461_v59, %v458_v60  ;;  %v470_v63 = vpack.c.bf16 %v464_v61, %v464_v61 }
  0xe6   : > { %838 = vst [vmem:[%s1199_s10 + $0x8] sm:$0xff] %v836_v62  }
  0xe7   : > { %475 = vst [vmem:[%s1199_s10 + $0x10] sm:$0xf] %v470_v63 }
  0xe8   : > { %480 = vadd.xlane.f32.xlu0 %v452_v53  ;;  %488 = vadd.xlane.f32.xlu2 %v464_v61  ;;  %v496_v0 = vmul.f32 %v452_v53, %v452_v53  ;;  %v497_v1 = vmul.f32 %v1196_v54, %v1196_v54  ;;  %v499_v2 = vmul.f32 %v461_v59, %v461_v59  ;;  %vm490_vm1 = vcmask 7168  }
  0xe9   : > { %484 = vadd.xlane.f32.xlu1 %v458_v60  ;;  %v498_v3 = vmul.f32 %v458_v60, %v458_v60  ;;  %v500_v4 = vmul.f32 %v464_v61, %v464_v61 }
  0xf0   : > { %482 = vadd.xlane.f32.xlu0 %v1196_v54  ;;  %501 = vadd.xlane.f32.xlu2 %v496_v0 }
  0xf1   : > { %486 = vadd.xlane.f32.xlu1 %v461_v59 }
  0xf8   : > { %503 = vadd.xlane.f32.xlu0 %v497_v1  ;;  %507 = vadd.xlane.f32.xlu2 %v499_v2 }
  0xf9   : > { %505 = vadd.xlane.f32.xlu1 %v498_v3 }
 0x100   : > { %509 = vadd.xlane.f32.xlu0 %v500_v4 }
 0x15b   : > { %v481_v5 = vpop.xlane.xlu0 %480  ;;  %v489_v6 = vpop.xlane.xlu2 %488 }
 0x15c   : > { %491 = vst.msk [vmem:[%s1143_s12] sm:$0xff] %vm490_vm1, %v481_v5  ;;  %v485_v7 = vpop.xlane.xlu1 %484 }
 0x15d   : > { %495 = vst.msk [vmem:[%s1143_s12 + $0x20] sm:$0xff] %vm490_vm1, %v489_v6 }
 0x15e   : > { %493 = vst.msk [vmem:[%s1143_s12 + $0x10] sm:$0xff] %vm490_vm1, %v485_v7 }
 0x163   : > { %v483_v8 = vpop.xlane.xlu0 %482  ;;  %v502_v9 = vpop.xlane.xlu2 %501 }
 0x164   : > { %492 = vst.msk [vmem:[%s1143_s12 + $0x8] sm:$0xff] %vm490_vm1, %v483_v8  ;;  %v487_v10 = vpop.xlane.xlu1 %486 }
 0x165   : > { %494 = vst.msk [vmem:[%s1143_s12 + $0x18] sm:$0xff] %vm490_vm1, %v487_v10 }
 0x166   : > { %511 = vst.msk [vmem:[%s1148_s25] sm:$0xff] %vm490_vm1, %v502_v9 }
 0x16b   : > { %v504_v11 = vpop.xlane.xlu0 %503  ;;  %v508_v12 = vpop.xlane.xlu2 %507 }
 0x16c   : > { %512 = vst.msk [vmem:[%s1148_s25 + $0x8] sm:$0xff] %vm490_vm1, %v504_v11  ;;  %v506_v13 = vpop.xlane.xlu1 %505 }
 0x16d   : > { %513 = vst.msk [vmem:[%s1148_s25 + $0x10] sm:$0xff] %vm490_vm1, %v506_v13 }
 0x16e   : > { %514 = vst.msk [vmem:[%s1148_s25 + $0x18] sm:$0xff] %vm490_vm1, %v508_v12 }
 0x173   : > { %v510_v14 = vpop.xlane.xlu0 %509 }
 0x174   : > { %515 = vst.msk [vmem:[%s1148_s25 + $0x20] sm:$0xff] %vm490_vm1, %v510_v14 }
 0x175 PF: > { %p824_p1 = scmp.ne.s32.totalorder %s972_s17, 1 }
 0x177   : > { %519 = sbr.rel (%p824_p1) target bundleno = 527 (0x20f), region = 74 }
 0x17c   : > { %v520_v15 = vlaneseq  ;;  %vm538_vm3 = vcmask 7168  }
 0x17e   : > { %v521_v16 = vand.u32 127, %v520_v15 }
 0x180   : > { %vm522_vm2 = vcmp.lt.s32.totalorder %v521_v16, 68 }
 0x181   : > { %v523_v17 = vsel %vm522_vm2, %v452_v53, 0.0  ;;  %v527_v18 = vsel %vm522_vm2, %v464_v61, 0.0  ;;  %v525_v19 = vsel %vm522_vm2, %v458_v60, 0.0  ;;  %v524_v21 = vsel %vm522_vm2, %v1196_v54, 0.0 }
 0x182   : > { %528 = vadd.xlane.f32.xlu0 %v523_v17  ;;  %536 = vadd.xlane.f32.xlu2 %v527_v18  ;;  %v544_v20 = vmul.f32 %v523_v17, %v523_v17  ;;  %v526_v22 = vsel %vm522_vm2, %v461_v59, 0.0  ;;  %v545_v23 = vmul.f32 %v524_v21, %v524_v21  ;;  %v546_v25 = vmul.f32 %v525_v19, %v525_v19 }
 0x183   : > { %532 = vadd.xlane.f32.xlu1 %v525_v19  ;;  %v547_v24 = vmul.f32 %v526_v22, %v526_v22  ;;  %v548_v26 = vmul.f32 %v527_v18, %v527_v18 }
 0x18a   : > { %530 = vadd.xlane.f32.xlu0 %v524_v21  ;;  %549 = vadd.xlane.f32.xlu2 %v544_v20 }
 0x18b   : > { %534 = vadd.xlane.f32.xlu1 %v526_v22 }
 0x192   : > { %551 = vadd.xlane.f32.xlu0 %v545_v23  ;;  %555 = vadd.xlane.f32.xlu2 %v547_v24 }
 0x193   : > { %553 = vadd.xlane.f32.xlu1 %v546_v25 }
 0x19a   : > { %557 = vadd.xlane.f32.xlu0 %v548_v26 }
 0x1f5   : > { %v529_v27 = vpop.xlane.xlu0 %528  ;;  %v537_v28 = vpop.xlane.xlu2 %536 }
 0x1f6   : > { %539 = vst.msk [vmem:[%s1143_s12] sm:$0xff] %vm538_vm3, %v529_v27  ;;  %v533_v29 = vpop.xlane.xlu1 %532 }
 0x1f7   : > { %543 = vst.msk [vmem:[%s1143_s12 + $0x20] sm:$0xff] %vm538_vm3, %v537_v28 }
 0x1f8   : > { %541 = vst.msk [vmem:[%s1143_s12 + $0x10] sm:$0xff] %vm538_vm3, %v533_v29 }
 0x1fd   : > { %v531_v30 = vpop.xlane.xlu0 %530  ;;  %v550_v31 = vpop.xlane.xlu2 %549 }
 0x1fe   : > { %540 = vst.msk [vmem:[%s1143_s12 + $0x8] sm:$0xff] %vm538_vm3, %v531_v30  ;;  %v535_v32 = vpop.xlane.xlu1 %534 }
 0x1ff   : > { %542 = vst.msk [vmem:[%s1143_s12 + $0x18] sm:$0xff] %vm538_vm3, %v535_v32 }
 0x200   : > { %559 = vst.msk [vmem:[%s1148_s25] sm:$0xff] %vm538_vm3, %v550_v31 }
 0x205   : > { %v552_v33 = vpop.xlane.xlu0 %551  ;;  %v556_v34 = vpop.xlane.xlu2 %555 }
 0x206   : > { %560 = vst.msk [vmem:[%s1148_s25 + $0x8] sm:$0xff] %vm538_vm3, %v552_v33  ;;  %v554_v35 = vpop.xlane.xlu1 %553 }
 0x207   : > { %561 = vst.msk [vmem:[%s1148_s25 + $0x10] sm:$0xff] %vm538_vm3, %v554_v35 }
 0x208   : > { %562 = vst.msk [vmem:[%s1148_s25 + $0x18] sm:$0xff] %vm538_vm3, %v556_v34 }
 0x20d   : > { %v558_v36 = vpop.xlane.xlu0 %557 }
 0x20e   : > { %563 = vst.msk [vmem:[%s1148_s25 + $0x20] sm:$0xff] %vm538_vm3, %v558_v36 }
 0x20f PF: > { %588 = sbr.rel (!%p1063_p6) target bundleno = 538 (0x21a), region = 78  ;;  %v609_v37 = vld [vmem:[%s1199_s10] sm:$0xf] (%p1063_p6)  ;;  %v611_v38 = vld [vmem:[%s1199_s10 + $0x4] sm:$0xf] (%p1063_p6) }
 0x210   : > { %s877_s15 = smul.u32 (%p1063_p6), 10, %s976_s18  ;;  %v613_v39 = vld [vmem:[%s1199_s10 + $0x8] sm:$0xf] (%p1063_p6)  ;;  %v615_v40 = vld [vmem:[%s1199_s10 + $0xc] sm:$0xf] (%p1063_p6) }
 0x211   : > { %v617_v41 = vld [vmem:[%s1199_s10 + $0x10] sm:$0xf] (%p1063_p6) }
 0x212   : > { %s590_s14 = sadd.s32 (%p1063_p6), %s972_s17, %s877_s15 }
 0x213   : > { %s825_s12 = sshll.u32 (%p1063_p6), %s590_s14, 2 }
 0x214   : > { %s592_s25 = scalar_lea.vmem %s1285_s2, %s825_s12 }
 0x215   : > { %610 = vst [vmem:[%s592_s25] sm:$0xf] %v609_v37 }
 0x216   : > { %612 = vst [vmem:[%s592_s25 + $0x8] sm:$0xf] %v611_v38 }
 0x217   : > { %614 = vst [vmem:[%s592_s25 + $0x10] sm:$0xf] %v613_v39 }
 0x218   : > { %616 = vst [vmem:[%s592_s25 + $0x18] sm:$0xf] %v615_v40 }
 0x219   : > { %618 = vst [vmem:[%s592_s25 + $0x20] sm:$0xf] %v617_v41 }
 0x21a PF: > { %s15_s21 = sadd.s32 1, %s988_s21   ;;  %s1289_s15 = smov %s968_s16 }
 0x21b   : > { %p12_p2 = scmp.ge.s32.totalorder %s15_s21, 6   ;;  %s1290_s16 = smov %s1071_s30 }
 0x21c   : > { %s1291_s17 = smov %s980_s19  ;;  %s1292_s18 = smov %s984_s20 }
 0x21d   : > { %s1293_s19 = smov %s1296_s22  ;;  %s1294_s20 = smov %s1300_s23 }
 0x21e   :  { %14 = sbr.rel (!%p12_p2) target bundleno = 4 (0x4), region = 174 }

</bundles_post_ra>
